<compile_context>
chip_gen: v7x
topology: tpu7x:2x2x1
jax: 0.10.0
libtpu: 0.0.40
codegen_flags: <defaults>
</compile_context>

<pallas_src>
import math
import jax
import jax.numpy as jnp
from jax.experimental import pallas as pl
from jax.experimental.pallas import tpu as pltpu


def _outconv_kernel(w_ref, x_ref, o_ref):
    # w_ref: (C_out, C_in) in VMEM — constant block across the grid (resident).
    # x_ref: (NB, C_in, T) in VMEM — T (spatial) on the 128-lane axis.
    # o_ref: (NB, C_out, T) in VMEM — already NCHW-ordered, lane-dense store.
    w = w_ref[...]
    nb = x_ref.shape[0]
    # Short static unroll over the batch block: a plain 2-D MXU matmul per
    # image avoids any in-kernel transpose of a (b, t, o) einsum result.
    for b in range(nb):
        o_ref[b] = jnp.dot(
            w, x_ref[b], preferred_element_type=jnp.float32
        ).astype(o_ref.dtype)


def _round_down_128(v):
    return max(128, (v // 128) * 128)


def _largest_divisor_leq(n, cap):
    cap = max(1, min(n, cap))
    for d in range(cap, 0, -1):
        if n % d == 0:
            return d
    return 1


def out_conv(x_nchw, weight, *,
             vmem_buffer_budget_bytes=12 * 1024 * 1024,  # double-buffered in+out
             max_lanes=32768):
    """1x1 conv, bias=False (== nn.Conv2d(in, out, kernel_size=1, bias=False)).

    x_nchw: (N, C_in, H, W)
    weight: (C_out, C_in, 1, 1)   -- PyTorch Conv2d weight layout
    returns (N, C_out, H, W)
    """
    N, C_in, H, W = x_nchw.shape
    C_out = weight.shape[0]
    HW = H * W
    dtype = x_nchw.dtype
    dtype_bytes = dtype.itemsize

    # Free reshapes (no data movement): keep NCHW memory order throughout.
    x_slab = x_nchw.reshape(N, C_in, HW)              # (N, C_in, H*W)
    # Cast once in the wrapper so the MXU runs natively in x's dtype (e.g. a
    # single-pass bf16 matmul instead of multi-pass f32 on v5e/v6e).
    w_mat = weight.reshape(C_out, C_in).astype(dtype)  # (C_out, C_in)

    # --- Tile selection (bandwidth-bound: biggest tile that fits the budget) ---
    lane_bytes = (C_in + C_out) * dtype_bytes          # HBM bytes per spatial lane
    cap_lanes = vmem_buffer_budget_bytes // (2 * lane_bytes)   # 2x: double-buffered
    cap_lanes = min(max_lanes, _round_down_128(cap_lanes))

    nb = 1
    if HW > cap_lanes:
        # Large images: big lane-dense spatial tiles; >= 2 tiles guaranteed.
        # The ragged last tile's out-of-range lanes carry stale VMEM values
        # through the matmul, but the output write is masked, so results are
        # exact (nothing reduces over the T axis).
        t_hw = cap_lanes
        num_hw_tiles = pl.cdiv(HW, t_hw)
    else:
        # Whole image per tile; amortize per-step overhead by blocking batch.
        t_hw = HW
        num_hw_tiles = 1
        nb_cap = max(1, vmem_buffer_budget_bytes // (2 * lane_bytes * HW))
        nb = _largest_divisor_leq(N, nb_cap)           # exact batch blocks
        # v7x has 2 TensorCores: keep >= 2 total grid steps so neither idles.
        if (N // nb) * num_hw_tiles < 2:
            if N >= 2:
                nb = _largest_divisor_leq(N, max(1, N // 2))
            elif HW >= 256:
                # Split H*W into two 128-aligned tiles (ragged edge masked).
                t_hw = ((pl.cdiv(HW, 2) + 127) // 128) * 128
                num_hw_tiles = pl.cdiv(HW, t_hw)
            # else: tiny single-step problem; leave as one step.

    num_batch_tiles = N // nb
    grid = (num_batch_tiles, num_hw_tiles)

    # Weight block index is constant across the grid -> Pallas fetches it once
    # and keeps it resident in VMEM.
    w_spec = pl.BlockSpec((C_out, C_in), lambda n, j: (0, 0))
    x_spec = pl.BlockSpec((nb, C_in, t_hw), lambda n, j: (n, 0, j))
    o_spec = pl.BlockSpec((nb, C_out, t_hw), lambda n, j: (n, 0, j))

    cost = pl.CostEstimate(
        flops=2 * N * C_out * C_in * HW,
        transcendentals=0,
        bytes_accessed=(N * C_in * HW + C_out * C_in + N * C_out * HW) * dtype_bytes,
    )

    out = pl.pallas_call(
        _outconv_kernel,
        out_shape=jax.ShapeDtypeStruct((N, C_out, HW), dtype),
        grid_spec=pltpu.PrefetchScalarGridSpec(
            num_scalar_prefetch=0,
            grid=grid,
            in_specs=[w_spec, x_spec],
            out_specs=o_spec,
        ),
        compiler_params=pltpu.CompilerParams(
            dimension_semantics=("parallel", "parallel"),
            # Buffers are budgeted to <= ~12 MiB double-buffered; 32 MiB scoped
            # limit gives headroom on every generation (v5e default is 16 MiB,
            # v7x physical is 64 MiB so 32 MiB is safe there too).
            vmem_limit_bytes=32 * 1024 * 1024,
        ),
        cost_estimate=cost,
    )(w_mat, x_slab)

    return out.reshape(N, C_out, H, W)


def init_outconv_weight(key, in_channels, out_channels, dtype=jnp.float32):
    # Mimics nn.Conv2d default init (kaiming_uniform, a=sqrt(5)):
    # uniform(-1/sqrt(fan_in), 1/sqrt(fan_in)), fan_in = in_channels * 1 * 1.
    bound = 1.0 / math.sqrt(in_channels)
    return jax.random.uniform(
        key, (out_channels, in_channels, 1, 1), dtype=dtype,
        minval=-bound, maxval=bound,
    )


if __name__ == "__main__":
    key = jax.random.PRNGKey(0)
    k_x, k_w, k_x2, k_w2 = jax.random.split(key, 4)

    # UNet OutConv-style shapes: small channels, 1x1 conv, bias=False.
    # (N=2 images -> grid (2, 1): two steps, feeds both v7x TensorCores.)
    N, C_in, H, W = 2, 4, 16, 16
    C_out = 3
    x = jax.random.normal(k_x, (N, C_in, H, W), dtype=jnp.float32)
    w = init_outconv_weight(k_w, C_in, C_out)

    y = jax.block_until_ready(out_conv(x, w))
    y_ref = jnp.einsum("nchw,oc->nohw", x, w.reshape(C_out, C_in))
    assert y.shape == (N, C_out, H, W)
    assert jnp.allclose(y, y_ref, atol=1e-5, rtol=1e-5)

    # Larger image / channel count with N=1 — exercises the H*W-split path
    # (single image forced into >= 2 lane-aligned spatial tiles).
    N2, C_in2, C_out2, H2, W2 = 1, 32, 8, 64, 64
    x2 = jax.random.normal(k_x2, (N2, C_in2, H2, W2), dtype=jnp.float32)
    w2 = init_outconv_weight(k_w2, C_in2, C_out2)

    y2 = jax.block_until_ready(out_conv(x2, w2))
    y2_ref = jnp.einsum("nchw,oc->nohw", x2, w2.reshape(C_out2, C_in2))
    assert y2.shape == (N2, C_out2, H2, W2)
    assert jnp.allclose(y2, y2_ref, atol=1e-3, rtol=1e-3)

    print("KERNEL_OK")
</pallas_src>

<mosaic_0001>
module attributes {stable_mosaic.version = 11 : i64} {
  func.func @_outconv_kernel(%arg0: i32, %arg1: i32, %arg2: memref<3x4xf32, #tpu.memory_space<vmem>>, %arg3: memref<1x4x256xf32, #tpu.memory_space<vmem>>, %arg4: memref<1x3x256xf32, #tpu.memory_space<vmem>>) attributes {dimension_semantics = [#tpu.dimension_semantics<parallel>, #tpu.dimension_semantics<parallel>], iteration_bounds = array<i64: 2, 1>, scalar_prefetch = 0 : i64, scratch_operands = 0 : i64, tpu.core_type = #tpu.core_type<tc>, window_params = [{pipeline_mode = #tpu.pipeline_mode<synchronous>, transform_indices = @transform_0, window_bounds = array<i64: 3, 4>}, {transform_indices = @transform_1, window_bounds = array<i64: 1, 4, 256>}, {transform_indices = @transform_2, window_bounds = array<i64: 1, 3, 256>}]} {
    %c0 = arith.constant 0 : index
    %c0_0 = arith.constant 0 : index
    %0 = vector.load %arg2[%c0, %c0_0] : memref<3x4xf32, #tpu.memory_space<vmem>>, vector<3x4xf32>
    %c0_1 = arith.constant 0 : index
    %c0_2 = arith.constant 0 : index
    %c0_3 = arith.constant 0 : index
    %1 = vector.load %arg3[%c0_1, %c0_2, %c0_3] : memref<1x4x256xf32, #tpu.memory_space<vmem>>, vector<1x4x256xf32>
    %2 = vector.shape_cast %1 : vector<1x4x256xf32> to vector<4x256xf32>
    %cst = arith.constant dense<0.000000e+00> : vector<3x256xf32>
    %3 = tpu.matmul %0, %2, %cst {dimension_numbers = #tpu.dot_dimension_numbers<[1], [0], [0], [1], [0, 0, 1, 1], [], []>} : vector<3x4xf32>, vector<4x256xf32>, vector<3x256xf32> -> vector<3x256xf32>
    %c0_4 = arith.constant 0 : index
    %c0_5 = arith.constant 0 : index
    %c0_6 = arith.constant 0 : index
    %4 = vector.load %arg4[%c0_4, %c0_5, %c0_6] : memref<1x3x256xf32, #tpu.memory_space<vmem>>, vector<1x3x256xf32>
    %5 = vector.shape_cast %4 : vector<1x3x256xf32> to vector<3x256xf32>
    %6 = vector.shape_cast %3 : vector<3x256xf32> to vector<1x3x256xf32>
    tpu.vector_store %arg4[%c0_4, %c0_5, %c0_6], %6 {strides = array<i32>} : memref<1x3x256xf32, #tpu.memory_space<vmem>>, vector<1x3x256xf32>,
    return
  }
  func.func @transform_0(%arg0: i32, %arg1: i32) -> (i32, i32) {
    %c0_i32 = arith.constant 0 : i32
    %c0_i32_0 = arith.constant 0 : i32
    %c0_i32_1 = arith.constant 0 : i32
    return %c0_i32, %c0_i32_0 : i32, i32
  }
  func.func @transform_1(%arg0: i32, %arg1: i32) -> (i32, i32, i32) {
    %c0_i32 = arith.constant 0 : i32
    %c0_i32_0 = arith.constant 0 : i32
    return %arg0, %c0_i32, %arg1 : i32, i32, i32
  }
  func.func @transform_2(%arg0: i32, %arg1: i32) -> (i32, i32, i32) {
    %c0_i32 = arith.constant 0 : i32
    %c0_i32_0 = arith.constant 0 : i32
    return %arg0, %c0_i32, %arg1 : i32, i32, i32
  }
}

</mosaic_0001>

<bundles_post_ra>
// kernel: tpu_custom_call.1
= control target key start
LH: loop header
LB: loop body
LE: loop exit
PB: predicated region body
PF: predicated region fallthrough
CT: control target
= control target key end

     0   :  { %7 = vsyncpa [#allocation3], 0  ;;  %s782_s0 = inlined_call_operand.hbm [shape: f32[3,4], index: 0, kind: input, shape index: {}]   ;;  %s783_s1 = inlined_call_operand.hbm [shape: f32[2,4,256], index: 1, kind: input, shape index: {}]   ;;  %s784_s2 = inlined_call_operand.vmem [shape: f32[2,3,256], index: 2, kind: output, shape index: {}]  }
   0x1   :  { %8 = vsyncpa [#allocation5], 0 }
   0x2   :  { %10 = vsyncpa [#allocation5 + $0x1], 0  ;;  %s619_s9 = smov 0   ;;  %s621_s10 = smov 0  }
   0x3   :  { %s623_s11 = smov 0   ;;  %s625_s12 = smov 0  }
   0x4   :  { %s627_s13 = smov 0   ;;  %s629_s14 = smov 0  }
   0x5 LB: > { %s399_s15 = sadd.s32 4294967295, %s599_s14   ;;  %p71_p0 = scmp.ne.s32.totalorder %s583_s10, %s579_s9  ;;  %s599_s14 = sphi %s629_s14, %s16_s14   ;;  %s595_s13 = sphi %s627_s13, %s803_s13   ;;  %s591_s12 = sphi %s625_s12, %s802_s12   ;;  %s587_s11 = sphi %s623_s11, %s801_s11   ;;  %s583_s10 = sphi %s621_s10, %s800_s10   ;;  %s579_s9 = sphi %s619_s9, %s799_s9  }
   0x6   : > { %p649_p1 = scmp.eq.s32.totalorder %s399_s15, 0  ;;  %p401_p2 = scmp.ge.s32.totalorder %s599_s14, 1 }
   0x7   : > { %p110_p3 = scmp.lt.s32.totalorder %s599_s14, 3  ;;  %s601_s19 = smov [#allocation2]  }
   0x8   : > { %s789_s16 = scalar_select %p649_p1, 1, 0 }
   0x9   : > { %p657_p4 = por %p649_p1, %p71_p0  ;;  %p661_p5 = pnand %p401_p2, %p110_p3 }
   0xa   : > { %s123_s20 = sshll.u32 %s601_s19, 4  ;;  %s28_s22 = sadd.s32 1, %s595_s13  ;;  %s124_s20 = int_to_ptr.vmem [resolvable:$true] %s123_s20 }
   0xb   : > { %s790_s17 = scalar_select %p657_p4, 1, 0 }
   0xc   : > { %s791_s18 = scalar_select %p661_p5, 1, 0 }
   0xd   : > { %p425_p6 = pneg %p661_p5  ;;  %s58_s23 = sadd.s32 1, %s587_s11 }
   0xe   : > { %p675_p8 = scmp.ge.s32.totalorder %s28_s22, 2  ;;  %s487_s27 = scalar_lea.hbm %s782_s0, 64 }
   0xf   : > { %p669_p7 = pnand %p425_p6, %p649_p1  ;;  %p488_p9 = scmp.ne.s32.totalorder %s782_s0, %s487_s27 }
  0x10   : > { %s793_s24 = scalar_select %p675_p8, 1, 0 }
  0x11   : > { %p489_p10 = pneg %p669_p7  ;;  %p494_p13 = scmp.lt.u32.totalorder %s487_s27, %s782_s0 }
  0x13   : > { %p490_p11 = pnand %p489_p10, %p488_p9 }
  0x15   : > { %p491_p12 = pneg %p490_p11 }
  0x17   : > { %p496_p0 = pnand %p494_p13, %p491_p12 }
  0x19   : > { %499 = shalt.err (!%p496_p0)
}
  0x1a   : > { %s500_s4 = scalar_lea.vmem %s124_s20, 64  ;;  %p508_p4 = scmp.lt.s32.totalorder %s124_s20, %s124_s20 }
  0x1b   : > { %p501_p2 = scmp.ne.s32.totalorder %s124_s20, %s500_s4  ;;  %p509_p1 = scmp.lt.s32.totalorder %s500_s4, %s500_s4 }
  0x1d   : > { %p503_p3 = pnand %p501_p2, %p489_p10  ;;  %p510_p5 = por %p509_p1, %p508_p4 }
  0x1f   : > { %p504_p6 = pneg %p503_p3 }
  0x21   : > { %p511_p8 = pnand %p510_p5, %p504_p6 }
  0x23   : > { %514 = shalt.err (!%p511_p8)
}
  0x24   : > { %428 = dma.hbm_to_vmem [thread:$0]  (!%p669_p7), %s782_s0, 64, %s124_s20, [#allocation3]  }
  0x25   : > { %p794_p9 = scmp.ne.s32.totalorder %s793_s24, 0  ;;  %p65_p1 = scmp.ne.s32.totalorder %s587_s11, %s583_s10 }
  0x26   : > { %p66_p4 = scmp.eq.s32.totalorder %s599_s14, 0  ;;  %p434_p5 = scmp.lt.s32.totalorder %s599_s14, 2 }
  0x27   : > { %s805_s22 = smov (%p794_p9, %s28_s22), 0  ;;  %s134_s8 = sand.u32 1, %s587_s11  }
  0x28   : > { %s53_s7 = ssub.s32 %s595_s13, %s805_s22  ;;  %p67_p10 = por %p66_p4, %p65_p1 }
  0x29   : > { %p56_p8 = scmp.eq.s32.totalorder %s53_s7, 0  ;;  %s417_s9 = sshll.u32 %s595_s13, 7 }
  0x2a   : > { %s404_s19 = sshll.u32 %s134_s8, 3  ;;  %s715_s20 = scalar_lea.hbm %s783_s1, %s417_s9 }
  0x2b   : > { %s710_s15 = scalar_select %p56_p8, %s587_s11, %s58_s23  }
  0x2c   : > { %s138_s24 = scalar_lea.vmem [#allocation4], %s404_s19  ;;  %p717_p7 = pnand %p434_p5, %p67_p10 }
  0x2d   : > { %s148_s26 = sshll.u32 %s138_s24, 4  ;;  %s135_s23 = scalar_lea.sflag [#allocation5], %s134_s8  ;;  %s721_s26 = int_to_ptr.vmem [resolvable:$true] %s148_s26 }
  0x2e   : > { %s515_s28 = scalar_lea.hbm %s715_s20, 128  ;;  %p517_p12 = pneg %p717_p7 }
  0x2f   : > { %p516_p11 = scmp.ne.s32.totalorder %s715_s20, %s515_s28  ;;  %s520_s3 = scalar_lea.hbm %s783_s1, 256 }
  0x30   : > { %p521_p2 = scmp.lt.u32.totalorder %s715_s20, %s783_s1  ;;  %p522_p3 = scmp.lt.u32.totalorder %s520_s3, %s515_s28 }
  0x31   : > { %p518_p13 = pnand %p517_p12, %p516_p11  ;;  %p524_p9 = scmp.lt.u32.totalorder %s515_s28, %s715_s20 }
  0x32   : > { %p523_p6 = por %p522_p3, %p521_p2 }
  0x33   : > { %p519_p0 = pneg %p518_p13 }
  0x34   : > { %p525_p1 = por %p524_p9, %p523_p6 }
  0x36   : > { %p526_p4 = pnand %p525_p1, %p519_p0 }
  0x38   : > { %529 = shalt.err (!%p526_p4)
}
  0x39   : > { %s530_s6 = scalar_lea.vmem %s721_s26, 128  ;;  %s602_s7 = smov [#allocation4]  }
  0x3a   : > { %p531_p5 = scmp.ne.s32.totalorder %s721_s26, %s530_s6  ;;  %s535_s8 = sshll.u32 %s602_s7, 4  ;;  %s536_s8 = int_to_ptr.vmem [resolvable:$false] %s535_s8 }
  0x3b   : > { %s537_s9 = scalar_lea.vmem %s536_s8, 256  ;;  %p538_p11 = scmp.lt.s32.totalorder %s721_s26, %s536_s8 }
  0x3c   : > { %p533_p8 = pnand %p531_p5, %p517_p12  ;;  %p539_p13 = scmp.lt.s32.totalorder %s537_s9, %s530_s6 }
  0x3e   : > { %p534_p10 = pneg %p533_p8  ;;  %p540_p2 = por %p539_p13, %p538_p11 }
  0x40   : > { %p541_p3 = pnand %p540_p2, %p534_p10 }
  0x42   : > { %544 = shalt.err (!%p541_p3)
}
  0x43   : > { %432 = dma.hbm_to_vmem [thread:$0]  (!%p717_p7), %s715_s20, 128, %s721_s26, %s135_s23  }
  0x44   : > { %p796_p0 = scmp.ne.s32.totalorder %s791_s18, 0 }
  0x45   : > { %p797_p12 = scmp.ne.s32.totalorder (!%p796_p0), %s789_s16, 0 }
  0x46   : > { %157 = sbr.rel (%p796_p0) target bundleno = 303 (0x12f), region = 28 }
  0x4d   : > { %570 = dma.done.wait (%p797_p12), [#allocation3], 64  }
  0x4e   : > { %572 = vsyncadd (%p797_p12), [#allocation3], 4294967232  ;;  %s163_s19 = sand.u32 1, %s583_s10   ;;  %p798_p6 = scmp.ne.s32.totalorder %s790_s17, 0 }
  0x4f   : > { %s409_s21 = sshll.u32 %s163_s19, 3  ;;  %s164_s25 = scalar_lea.sflag [#allocation5], %s163_s19 }
  0x50   : > { %s167_s24 = scalar_lea.vmem [#allocation4], %s409_s21 }
  0x51   : > { %574 = dma.done.wait (%p798_p6), %s164_s25, 128  }
  0x52   : > { %576 = vsyncadd (%p798_p6), %s164_s25, 4294967168  ;;  %v603_v0 = vmov 0.0   ;;  %v204_v1 = vld [vmem:[%s167_s24] sm:$0xff]  ;;  %vm211_vm0 = vcmask 1043456   ;;  %v203_v3 = vld [vmem:[#allocation2] sm:$0x7] }
  0x53   : > { %280 = vmatprep.mubr.f32.mxu0 %v603_v0  ;;  %v206_v2 = vcombine.high %v204_v1, %v204_v1  ;;  %vm207_vm1 = vcmask 31744   ;;  %p194_p7 = scmp.lt.s32.totalorder %s591_s12, 1 }
  0x55   : > { %412 = vmatprep.subr.msk.mxu0 %vm211_vm0, %v206_v2  ;;  %s807_s12 = smov (!%p194_p7, %s591_s12), 1 }
  0x56   : > { %413 = vmatpush1.msk.msra.mxu0 %vm211_vm0, %v204_v1  ;;  %s418_s16 = sshll.u32 %s807_s12, 3 }
  0x57   : > { %414 = vmatmul.mubr.msk.f32.vlgmr.msra.gmra.mrb[0].mxu0 %vm207_vm1, %v203_v3  ;;  %s201_s17 = scalar_lea.vmem %s784_s2, %s418_s16 }
 0x12a   : > { %v282_v4 = vpop.f32.mrb[0].mxu0 }
 0x12b   : > { %v284_v5 = vpop.f32.mrb[1].mxu0 }
 0x12c   : > { %v289_v6 = vcombine.low %v282_v4, %v284_v5 }
 0x12e   : > { %291 = vst [vmem:[%s201_s17] sm:$0x77] %v289_v6 }
 0x12f PF: > { %s16_s14 = sadd.s32 1, %s599_s14   ;;  %s799_s9 = smov %s583_s10 }
 0x130   : > { %p13_p9 = scmp.ge.s32.totalorder %s16_s14, 4   ;;  %s800_s10 = smov %s587_s11 }
 0x131   : > { %s801_s11 = smov %s710_s15  ;;  %s802_s12 = smov %s595_s13 }
 0x132   : > { %s803_s13 = smov %s805_s22  ;;  %15 = sbr.rel (!%p13_p9) target bundleno = 5 (0x5), region = 73 }
 0x139   :  { %322 = vsyncpa [#allocation3], 1 }
 0x13a   :  { %324 = vsyncpa [#allocation3 + $0x1], 1 }
 0x13b   :  { %325 = vsyncpa [#allocation5], 1 }
 0x13c   :  { %327 = vsyncpa [#allocation5 + $0x1], 1 }

</bundles_post_ra>
